<compile_context>
chip_gen: v5e
topology: v5e:2x2
jax: 0.10.0
libtpu: 0.0.40
codegen_flags: <defaults>
</compile_context>

<pallas_src>
import jax
import jax.numpy as jnp
from jax.experimental import pallas as pl
from jax.experimental.pallas import tpu as pltpu


def _round_up(x: int, m: int) -> int:
    return ((x + m - 1) // m) * m


def _cdiv(a: int, b: int) -> int:
    return (a + b - 1) // b


def _linear_kernel(x_ref, wt_ref, b_ref, o_ref):
    """One (tm, tn) output tile, full-K contraction in a single MXU pass.

    x_ref:  (tm, D_in)   activation tile (full K extent)
    wt_ref: (D_in, tn)   pre-transposed weight tile (full K extent)
    b_ref:  (1, tn)      bias tile (f32)
    o_ref:  (tm, tn)     output tile
    """
    y = jnp.dot(x_ref[...], wt_ref[...], preferred_element_type=jnp.float32)
    o_ref[...] = (y + b_ref[...]).astype(o_ref.dtype)


def linear_forward(
    x,
    weight,
    bias,
    *,
    tm_max: int = 512,
    tn_max: int = 512,
    use_bf16: bool = False,
    vmem_budget_bytes: int = 24 * 1024 * 1024,
):
    """Equivalent of torch.nn.Linear: y = x @ weight.T + bias.

    x:      (B, D_in)     float32
    weight: (D_out, D_in) float32   (PyTorch nn.Linear layout)
    bias:   (D_out,)      float32
    returns (B, D_out)    float32
    """
    B, D_in = x.shape
    D_out, D_in_w = weight.shape
    assert D_in_w == D_in, "weight/in-feature mismatch"
    out_dtype = x.dtype

    # ---- Balanced tile selection (minimize padding waste) -------------------
    n_m = max(1, _cdiv(B, tm_max))
    tm = min(_round_up(_cdiv(B, n_m), 8), _round_up(B, 8))

    d_out_128 = _round_up(D_out, 128)
    n_n = max(1, _cdiv(d_out_128, tn_max))
    tn = _round_up(_cdiv(d_out_128, n_n), 128)

    in_itemsize = 2 if use_bf16 else jnp.dtype(x.dtype).itemsize
    out_itemsize = jnp.dtype(out_dtype).itemsize

    def _vmem_bytes(tm_, tn_):
        # double-buffered x tile + weight tile + output tile + bias tile
        return 2 * (
            tm_ * D_in * in_itemsize
            + D_in * tn_ * in_itemsize
            + tm_ * tn_ * out_itemsize
            + tn_ * 4
        )

    # Shrink tiles (rarely triggered for classifier-head shapes) so the
    # double-buffered working set stays well inside every generation's VMEM
    # (v7x has only 64 MiB physical per TensorCore).
    while _vmem_bytes(tm, tn) > vmem_budget_bytes and (tm > 8 or tn > 128):
        if tm >= tn and tm > 8:
            tm = max(8, _round_up(tm // 2, 8))
        elif tn > 128:
            tn = max(128, _round_up(tn // 2, 128))
        else:
            break

    Bp = _round_up(B, tm)
    Doutp = _round_up(D_out, tn)

    # ---- One-time parameter prep (transpose + N-pad only; K is never padded)
    if Doutp != D_out:
        weight = jnp.pad(weight, ((0, Doutp - D_out), (0, 0)))
        bias = jnp.pad(bias, (0, Doutp - D_out))
    wt = weight.T  # (D_in, Doutp) -- plain MXU feed, no in-kernel transpose
    bias2d = bias.reshape(1, Doutp).astype(jnp.float32)

    x_in = x
    if Bp != B:
        x_in = jnp.pad(x_in, ((0, Bp - B), (0, 0)))

    if use_bf16:
        # Opt-in fast path: bf16 operands, f32 accumulation on the MXU.
        x_in = x_in.astype(jnp.bfloat16)
        wt = wt.astype(jnp.bfloat16)

    grid = (Bp // tm, Doutp // tn)

    out = pl.pallas_call(
        _linear_kernel,
        out_shape=jax.ShapeDtypeStruct((Bp, Doutp), out_dtype),
        grid=grid,
        in_specs=[
            # Full-K activation tile: last dim equals the full array dim, so it
            # is legal even when D_in is not a multiple of 128.
            pl.BlockSpec((tm, D_in), lambda i, j: (i, 0)),
            # Full-K, pre-transposed weight tile; stays VMEM-resident when
            # the N grid collapses to a single block (typical head shapes).
            pl.BlockSpec((D_in, tn), lambda i, j: (0, j)),
            pl.BlockSpec((1, tn), lambda i, j: (0, j)),
        ],
        out_specs=pl.BlockSpec((tm, tn), lambda i, j: (i, j)),
        compiler_params=pltpu.CompilerParams(
            dimension_semantics=("parallel", "parallel"),
            vmem_limit_bytes=48 * 1024 * 1024,
        ),
    )(x_in, wt, bias2d)

    if (Bp, Doutp) != (B, D_out):
        out = out[:B, :D_out]
    return out


if __name__ == "__main__":
    # --- Case 1: tiny classifier-head shapes (single-tile path) -------------
    key = jax.random.PRNGKey(0)
    B, D_in, D_out = 8, 64, 32
    kx, kw, kb = jax.random.split(key, 3)
    x = jax.random.normal(kx, (B, D_in), dtype=jnp.float32)
    weight = jax.random.normal(kw, (D_out, D_in), dtype=jnp.float32) * 0.05
    bias = jax.random.normal(kb, (D_out,), dtype=jnp.float32) * 0.05

    y = jax.block_until_ready(linear_forward(x, weight, bias))
    y_ref = x @ weight.T + bias
    assert y.shape == (B, D_out)
    assert jnp.allclose(y, y_ref, atol=1e-4, rtol=1e-4)

    # --- Case 2: non-128-aligned D_in / D_out (N padding, no K padding) -----
    B2, D_in2, D_out2 = 16, 320, 200
    kx2, kw2, kb2 = jax.random.split(jax.random.PRNGKey(1), 3)
    x2 = jax.random.normal(kx2, (B2, D_in2), dtype=jnp.float32)
    weight2 = jax.random.normal(kw2, (D_out2, D_in2), dtype=jnp.float32) * 0.05
    bias2 = jax.random.normal(kb2, (D_out2,), dtype=jnp.float32) * 0.05

    y2 = jax.block_until_ready(linear_forward(x2, weight2, bias2))
    y2_ref = x2 @ weight2.T + bias2
    assert y2.shape == (B2, D_out2)
    assert jnp.allclose(y2, y2_ref, atol=1e-4, rtol=1e-4)

    # --- Case 3: multi-tile M/N grid with balanced tm (B=300 -> tm=104) -----
    B3, D_in3, D_out3 = 300, 512, 384
    kx3, kw3, kb3 = jax.random.split(jax.random.PRNGKey(2), 3)
    x3 = jax.random.normal(kx3, (B3, D_in3), dtype=jnp.float32)
    weight3 = jax.random.normal(kw3, (D_out3, D_in3), dtype=jnp.float32) * 0.05
    bias3 = jax.random.normal(kb3, (D_out3,), dtype=jnp.float32) * 0.05

    y3 = jax.block_until_ready(
        linear_forward(x3, weight3, bias3, tm_max=128, tn_max=128)
    )
    y3_ref = x3 @ weight3.T + bias3
    assert y3.shape == (B3, D_out3)
    assert jnp.allclose(y3, y3_ref, atol=1e-3, rtol=1e-3)

    # --- Case 4: opt-in bf16 fast path (f32 MXU accumulation) ---------------
    y4 = jax.block_until_ready(linear_forward(x2, weight2, bias2, use_bf16=True))
    assert y4.shape == (B2, D_out2)
    assert jnp.allclose(y4, y2_ref, atol=5e-2, rtol=5e-2)

    print("KERNEL_OK")
</pallas_src>

<mosaic_0001>
module attributes {stable_mosaic.version = 11 : i64} {
  func.func @_linear_kernel(%arg0: i32, %arg1: i32, %arg2: memref<8x64xf32, #tpu.memory_space<vmem>>, %arg3: memref<64x128xf32, #tpu.memory_space<vmem>>, %arg4: memref<1x128xf32, #tpu.memory_space<vmem>>, %arg5: memref<8x128xf32, #tpu.memory_space<vmem>>) attributes {dimension_semantics = [#tpu.dimension_semantics<parallel>, #tpu.dimension_semantics<parallel>], iteration_bounds = array<i64: 1, 1>, scalar_prefetch = 0 : i64, scratch_operands = 0 : i64, tpu.core_type = #tpu.core_type<tc>, window_params = [{transform_indices = @transform_0, window_bounds = array<i64: 8, 64>}, {transform_indices = @transform_1, window_bounds = array<i64: 64, 128>}, {transform_indices = @transform_2, window_bounds = array<i64: 1, 128>}, {transform_indices = @transform_3, window_bounds = array<i64: 8, 128>}]} {
    %c0 = arith.constant 0 : index
    %c0_0 = arith.constant 0 : index
    %0 = vector.load %arg2[%c0, %c0_0] : memref<8x64xf32, #tpu.memory_space<vmem>>, vector<8x64xf32>
    %c0_1 = arith.constant 0 : index
    %c0_2 = arith.constant 0 : index
    %1 = vector.load %arg3[%c0_1, %c0_2] : memref<64x128xf32, #tpu.memory_space<vmem>>, vector<64x128xf32>
    %cst = arith.constant dense<0.000000e+00> : vector<8x128xf32>
    %2 = tpu.matmul %0, %1, %cst {dimension_numbers = #tpu.dot_dimension_numbers<[1], [0], [0], [1], [0, 0, 1, 1], [], []>} : vector<8x64xf32>, vector<64x128xf32>, vector<8x128xf32> -> vector<8x128xf32>
    %c0_3 = arith.constant 0 : index
    %c0_4 = arith.constant 0 : index
    %3 = vector.load %arg4[%c0_3, %c0_4] : memref<1x128xf32, #tpu.memory_space<vmem>>, vector<1x128xf32>
    %4 = vector.broadcast %3 : vector<1x128xf32> to vector<8x128xf32>
    %5 = arith.addf %2, %4 : vector<8x128xf32>
    %c0_5 = arith.constant 0 : index
    %c0_6 = arith.constant 0 : index
    %6 = vector.load %arg5[%c0_5, %c0_6] : memref<8x128xf32, #tpu.memory_space<vmem>>, vector<8x128xf32>
    tpu.vector_store %arg5[%c0_5, %c0_6], %5 {strides = array<i32>} : memref<8x128xf32, #tpu.memory_space<vmem>>, vector<8x128xf32>,
    return
  }
  func.func @transform_0(%arg0: i32, %arg1: i32) -> (i32, i32) {
    %c0_i32 = arith.constant 0 : i32
    %c0_i32_0 = arith.constant 0 : i32
    return %arg0, %c0_i32 : i32, i32
  }
  func.func @transform_1(%arg0: i32, %arg1: i32) -> (i32, i32) {
    %c0_i32 = arith.constant 0 : i32
    %c0_i32_0 = arith.constant 0 : i32
    return %c0_i32, %arg1 : i32, i32
  }
  func.func @transform_2(%arg0: i32, %arg1: i32) -> (i32, i32) {
    %c0_i32 = arith.constant 0 : i32
    %c0_i32_0 = arith.constant 0 : i32
    return %c0_i32, %arg1 : i32, i32
  }
  func.func @transform_3(%arg0: i32, %arg1: i32) -> (i32, i32) {
    %c0_i32 = arith.constant 0 : i32
    return %arg0, %arg1 : i32, i32
  }
}

</mosaic_0001>

<bundles_post_ra>
// kernel: tpu_custom_call.1
= control target key start
LH: loop header
LB: loop body
LE: loop exit
PB: predicated region body
PF: predicated region fallthrough
CT: control target
= control target key end

     0   :  { %8 = vsyncpa [#allocation3], 0  ;;  %s223_s0 = inlined_call_operand.hbm [shape: f32[8,64], index: 0, kind: input, shape index: {}]   ;;  %s224_s1 = inlined_call_operand.hbm [shape: f32[64,128], index: 1, kind: input, shape index: {}]   ;;  %s225_s2 = inlined_call_operand.vmem [shape: f32[1,128], index: 2, kind: input, shape index: {}]   ;;  %s226_s3 = inlined_call_operand.hbm [shape: f32[8,128], index: 3, kind: output, shape index: {}]  }
   0x1   :  { %9 = vsyncpa [#allocation6], 0 }
   0x2   :  { %10 = vsyncpa [#allocation4], 0  ;;  %s16_s14 = sshll.u32 %s223_s0, 4  ;;  %s186_s15 = smov [#allocation2]   ;;  %s17_s14 = int_to_ptr.hbm [resolvable:$true] %s16_s14 }
   0x3   :  { %s18_s16 = sshll.u32 %s186_s15, 4  ;;  %s26_s19 = sshll.u32 %s224_s1, 4  ;;  %s19_s16 = int_to_ptr.vmem [resolvable:$true] %s18_s16  ;;  %s27_s19 = int_to_ptr.hbm [resolvable:$true] %s26_s19 }
   0x4   :  { %21 = dma.hbm_to_vmem [thread:$0]  %s17_s14, 128, %s19_s16, [#allocation3]  }
   0x5   :  { %s187_s20 = smov [#allocation5]   ;;  %s188_s22 = smov 128  }
   0x6   :  { %s28_s21 = sshll.u32 %s187_s20, 4  ;;  %s189_s23 = smov 8   ;;  %s29_s21 = int_to_ptr.vmem [resolvable:$true] %s28_s21 }
   0x7   :  { %34 = dma.hbm_to_vmem [thread:$0]  %s27_s19, 1024, %s29_s21, [#allocation6], %s188_s22, %s188_s22, %s189_s23  }
   0x8   :  { %180 = dma.done.wait [#allocation3], 128  }
   0x9   :  { %181 = vsyncadd [#allocation3], 4294967168 }
   0xa   :  { %182 = dma.done.wait [#allocation6], 1024  }
   0xb   :  { %183 = vsyncadd [#allocation6], 4294966272  ;;  %v53_v0 = vld [vmem:[#allocation5 + $0x38] sm:$0xff]  ;;  %v52_v1 = vld [vmem:[#allocation5 + $0x30] sm:$0xff]  ;;  %vm58_vm0 = vcmask 523264   ;;  %s190_s24 = smov [#allocation7]  }
   0xc   :  { %70 = vmatpush.msra.mxu0 %v53_v0  ;;  %v51_v2 = vld [vmem:[#allocation5 + $0x28] sm:$0xff]  ;;  %v50_v3 = vld [vmem:[#allocation5 + $0x20] sm:$0xff]  ;;  %v49_v4 = vld [vmem:[#allocation5 + $0x18] sm:$0xff]  ;;  %s88_s25 = sshll.u32 %s190_s24, 4  ;;  %s90_s28 = sshll.u32 %s226_s3, 4  ;;  %s89_s25 = int_to_ptr.vmem [resolvable:$true] %s88_s25  ;;  %s91_s28 = int_to_ptr.hbm [resolvable:$true] %s90_s28 }
   0xd   :  { %v48_v5 = vld [vmem:[#allocation5 + $0x10] sm:$0xff]  ;;  %v47_v6 = vld [vmem:[#allocation5 + $0x8] sm:$0xff]  ;;  %v46_v7 = vld [vmem:[#allocation5] sm:$0xff] }
   0xe   :  { %71 = vmatpush.msra.mxu0 %v52_v1  ;;  %v45_v8 = vld [vmem:[#allocation2] sm:$0xff] }
   0xf   :  { %v107_v9 = vld [vmem:[%s225_s2] ss:$0 sm:$0xff] }
  0x10   :  { %72 = vmatpush.msra.mxu0 %v51_v2 }
  0x12   :  { %73 = vmatpush.msra.mxu0 %v50_v3 }
  0x14   :  { %74 = vmatpush.msra.mxu0 %v49_v4 }
  0x16   :  { %75 = vmatpush.msra.mxu0 %v48_v5 }
  0x18   :  { %76 = vmatpush.msra.mxu0 %v47_v6 }
  0x1a   :  { %77 = vmatpush.msra.mxu0 %v46_v7 }
  0x1b   :  { %101 = vmatmul.msk.f32.vlgmr.msra.gmra.mxu0 %vm58_vm0, %v45_v8 }
  0x98   :  { %v79_v10 = vpop.f32.mrf.mxu0 }
  0x99   :  { %v80_v11 = vadd.f32 %v107_v9, %v79_v10 }
  0x9b   :  { %82 = vst [vmem:[#allocation7] sm:$0xff] %v80_v11 }
  0x9c   :  { %93 = dma.vmem_to_hbm [thread:$0]  %s89_s25, 128, %s91_s28, [#allocation4]  }
  0x9d   :  { %184 = dma.done.wait [#allocation4], 128  }
  0x9e   :  { %185 = vsyncadd [#allocation4], 4294967168 }
  0x9f   :  { %98 = vsyncpa [#allocation3], 1 }
  0xa0   :  { %99 = vsyncpa [#allocation6], 1 }
  0xa1   :  { %100 = vsyncpa [#allocation4], 1 }

</bundles_post_ra>
